<compile_context>
chip_gen: v7x
topology: tpu7x:2x2x1
jax: 0.10.0
libtpu: 0.0.40
codegen_flags: <defaults>
</compile_context>

<pallas_src>
import jax
import jax.numpy as jnp
from jax.experimental import pallas as pl
from jax.experimental.pallas import tpu as pltpu

LANE = 128  # TPU lane width; hidden / action dims are padded to a multiple of this.


def dqn_kernel(x_ref, w1_ref, b1_ref, w2_ref, b2_ref, w3_ref, b3_ref, o_ref):
    # x: (TB, S) f32 ; w*: (*, 128) bf16 ; b*: (1, 128) f32 ; o: (TB, A) f32
    x = x_ref[...].astype(jnp.bfloat16)                       # cast folded into kernel
    h1 = jnp.dot(x, w1_ref[...], preferred_element_type=jnp.float32) + b1_ref[...]
    h1 = jnp.maximum(h1, 0.0).astype(jnp.bfloat16)            # ReLU in f32, back to MXU dtype
    h2 = jnp.dot(h1, w2_ref[...], preferred_element_type=jnp.float32) + b2_ref[...]
    h2 = jnp.maximum(h2, 0.0).astype(jnp.bfloat16)            # ReLU
    out = jnp.dot(h2, w3_ref[...], preferred_element_type=jnp.float32) + b3_ref[...]
    # Store only the real action columns -> 32x less HBM writeback than the
    # padded (TB, 128) f32 output, and no post-kernel column-slice pass.
    o_ref[...] = out[:, : o_ref.shape[-1]]


def _cdiv(a, d):
    return -(-a // d)


def dqn_forward(x, padded_params, num_actions=4, block_b=2048):
    """x: (B, ...) -> flattened to (B, num_states). Returns (B, num_actions) Q-values."""
    w1, b1, w2, b2, w3, b3 = padded_params
    b = x.shape[0]
    x2d = x.reshape(b, -1)                                    # t.flatten(start_dim=1); stays f32
    s = x2d.shape[1]

    # Batch tiling:
    #   * >= 2 grid steps once the batch is big enough, so the "parallel" batch
    #     axis can be split across v7x's two TensorCores;
    #   * more steps only once a single tile would exceed block_b rows
    #     (big tiles amortize the ~0.35 us per-grid-step overhead);
    #   * tiles are multiples of 8 sublanes; padded rows (zeros) are sliced off.
    n_steps = max(1, min(_cdiv(b, 8), max(2 if b >= 16 else 1, _cdiv(b, block_b))))
    tb = _cdiv(_cdiv(b, n_steps), 8) * 8
    b_pad = n_steps * tb
    if b_pad != b:
        x2d = jnp.pad(x2d, ((0, b_pad - b), (0, 0)))

    def resident(shape):
        # Same block every grid step -> stays VMEM-resident across the batch loop.
        return pl.BlockSpec(shape, lambda i: (0, 0))

    q = pl.pallas_call(
        dqn_kernel,
        out_shape=jax.ShapeDtypeStruct((b_pad, num_actions), jnp.float32),
        grid=(n_steps,),
        in_specs=[
            pl.BlockSpec((tb, s), lambda i: (i, 0)),          # activations: tiled on batch
            resident(w1.shape), resident(b1.shape),           # weights / biases resident
            resident(w2.shape), resident(b2.shape),
            resident(w3.shape), resident(b3.shape),
        ],
        out_specs=pl.BlockSpec((tb, num_actions), lambda i: (i, 0)),
        compiler_params=pltpu.CompilerParams(
            dimension_semantics=("parallel",)),               # megacore-shard the batch
    )(x2d, w1, b1, w2, b2, w3, b3)

    return q if b_pad == b else q[:b]                         # row slice only (no column slice)


def init_params(key, num_states, hidden=100, num_actions=4):
    """Logical (unpadded) params matching nn.Linear shapes; W stored as (in, out)."""
    k1, k2, k3, k4, k5, k6 = jax.random.split(key, 6)

    def linear(kw, kb, fan_in, fan_out):
        bound = 1.0 / jnp.sqrt(float(fan_in))
        w = jax.random.uniform(kw, (fan_in, fan_out), jnp.float32, -bound, bound)
        bias = jax.random.uniform(kb, (1, fan_out), jnp.float32, -bound, bound)
        return w, bias

    w1, b1 = linear(k1, k2, num_states, hidden)
    w2, b2 = linear(k3, k4, hidden, hidden)
    w3, b3 = linear(k5, k6, hidden, num_actions)
    return (w1, b1, w2, b2, w3, b3)


def pad_params(params, lane=LANE):
    """Zero-pad hidden/action dims to `lane` and cast weights to bf16 (done once).

    Padded hidden units have zero weight and zero bias, produce 0 through ReLU,
    and contribute 0 downstream; padded action columns are never stored (the
    kernel writes only the real 4 Q columns) -> results are exactly those of
    the unpadded network (up to bf16 MXU-input rounding).  Biases stay float32
    (added after the f32 MXU accumulate).
    """
    w1, b1, w2, b2, w3, b3 = params
    hid, act = w1.shape[1], w3.shape[1]
    hp = ((hid + lane - 1) // lane) * lane
    ap = ((act + lane - 1) // lane) * lane

    def pad(a, rows, cols):
        return jnp.pad(a, ((0, rows - a.shape[0]), (0, cols - a.shape[1])))

    w1p = pad(w1, w1.shape[0], hp).astype(jnp.bfloat16)
    b1p = pad(b1, 1, hp)
    w2p = pad(w2, hp, hp).astype(jnp.bfloat16)
    b2p = pad(b2, 1, hp)
    w3p = pad(w3, hp, ap).astype(jnp.bfloat16)
    b3p = pad(b3, 1, ap)
    return (w1p, b1p, w2p, b2p, w3p, b3p)


def reference_forward(x, params, compute_dtype=jnp.float32):
    """Plain-JAX reference mirroring the PyTorch forward.

    compute_dtype=bfloat16 mirrors the kernel's MXU dtype (bf16 operands with
    f32 accumulation); compute_dtype=float32 is the exact PyTorch semantics.
    """
    w1, b1, w2, b2, w3, b3 = params
    t = x.reshape(x.shape[0], -1)

    def layer(a, w, b):
        return jnp.dot(a.astype(compute_dtype), w.astype(compute_dtype),
                       preferred_element_type=jnp.float32) + b

    t = jnp.maximum(layer(t, w1, b1), 0.0)
    t = jnp.maximum(layer(t, w2, b2), 0.0)
    return layer(t, w3, b3)


if __name__ == "__main__":
    key = jax.random.PRNGKey(0)
    num_states = 8          # Lunar Lander V2 observation dim
    num_actions = 4

    kx, kp, kx2 = jax.random.split(key, 3)
    params = init_params(kp, num_states, hidden=100, num_actions=num_actions)
    padded = pad_params(params)

    # Small batch (single grid step).
    x = jax.random.normal(kx, (8, num_states), jnp.float32)
    q = jax.block_until_ready(dqn_forward(x, padded, num_actions=num_actions))
    assert q.shape == (8, num_actions)
    q_ref_mxu = reference_forward(x, params, compute_dtype=jnp.bfloat16)
    q_ref_f32 = reference_forward(x, params, compute_dtype=jnp.float32)
    assert jnp.allclose(q, q_ref_mxu, atol=1e-3, rtol=1e-3), "mismatch vs bf16 reference"
    assert jnp.allclose(q, q_ref_f32, atol=2e-2, rtol=2e-2), "mismatch vs f32 reference"

    # Multi-step grid + non-multiple-of-tile batch (exercises row padding and
    # the 2-way batch split used for v7x megacore).
    xb = jax.random.normal(kx2, (100, num_states), jnp.float32)
    qb = jax.block_until_ready(dqn_forward(xb, padded, num_actions=num_actions))
    assert qb.shape == (100, num_actions)
    qb_ref = reference_forward(xb, params, compute_dtype=jnp.bfloat16)
    assert jnp.allclose(qb, qb_ref, atol=1e-3, rtol=1e-3), "batched mismatch vs bf16 reference"

    print("KERNEL_OK")
</pallas_src>

<mosaic_0001>
module attributes {stable_mosaic.version = 11 : i64} {
  func.func @dqn_kernel(%arg0: i32, %arg1: memref<8x8xf32, #tpu.memory_space<vmem>>, %arg2: memref<8x128xbf16, #tpu.memory_space<vmem>>, %arg3: memref<1x128xf32, #tpu.memory_space<vmem>>, %arg4: memref<128x128xbf16, #tpu.memory_space<vmem>>, %arg5: memref<1x128xf32, #tpu.memory_space<vmem>>, %arg6: memref<128x128xbf16, #tpu.memory_space<vmem>>, %arg7: memref<1x128xf32, #tpu.memory_space<vmem>>, %arg8: memref<8x4xf32, #tpu.memory_space<vmem>>) attributes {dimension_semantics = [#tpu.dimension_semantics<parallel>], iteration_bounds = array<i64: 1>, scalar_prefetch = 0 : i64, scratch_operands = 0 : i64, tpu.core_type = #tpu.core_type<tc>, window_params = [{transform_indices = @transform_0, window_bounds = array<i64: 8, 8>}, {pipeline_mode = #tpu.pipeline_mode<synchronous>, transform_indices = @transform_1, window_bounds = array<i64: 8, 128>}, {pipeline_mode = #tpu.pipeline_mode<synchronous>, transform_indices = @transform_2, window_bounds = array<i64: 1, 128>}, {pipeline_mode = #tpu.pipeline_mode<synchronous>, transform_indices = @transform_3, window_bounds = array<i64: 128, 128>}, {pipeline_mode = #tpu.pipeline_mode<synchronous>, transform_indices = @transform_4, window_bounds = array<i64: 1, 128>}, {pipeline_mode = #tpu.pipeline_mode<synchronous>, transform_indices = @transform_5, window_bounds = array<i64: 128, 128>}, {pipeline_mode = #tpu.pipeline_mode<synchronous>, transform_indices = @transform_6, window_bounds = array<i64: 1, 128>}, {transform_indices = @transform_7, window_bounds = array<i64: 8, 4>}]} {
    %c0 = arith.constant 0 : index
    %c0_0 = arith.constant 0 : index
    %0 = vector.load %arg1[%c0, %c0_0] : memref<8x8xf32, #tpu.memory_space<vmem>>, vector<8x8xf32>
    %1 = arith.truncf %0 : vector<8x8xf32> to vector<8x8xbf16>
    %c0_1 = arith.constant 0 : index
    %c0_2 = arith.constant 0 : index
    %2 = vector.load %arg2[%c0_1, %c0_2] : memref<8x128xbf16, #tpu.memory_space<vmem>>, vector<8x128xbf16>
    %cst = arith.constant dense<0.000000e+00> : vector<8x128xf32>
    %3 = tpu.matmul %1, %2, %cst {dimension_numbers = #tpu.dot_dimension_numbers<[1], [0], [0], [1], [0, 0, 1, 1], [], []>} : vector<8x8xbf16>, vector<8x128xbf16>, vector<8x128xf32> -> vector<8x128xf32>
    %c0_3 = arith.constant 0 : index
    %c0_4 = arith.constant 0 : index
    %4 = vector.load %arg3[%c0_3, %c0_4] : memref<1x128xf32, #tpu.memory_space<vmem>>, vector<1x128xf32>
    %5 = vector.broadcast %4 : vector<1x128xf32> to vector<8x128xf32>
    %6 = arith.addf %3, %5 : vector<8x128xf32>
    %cst_5 = arith.constant 0.000000e+00 : f32
    %7 = vector.broadcast %cst_5 : f32 to vector<8x128xf32>
    %8 = arith.maximumf %6, %7 : vector<8x128xf32>
    %9 = arith.truncf %8 : vector<8x128xf32> to vector<8x128xbf16>
    %c0_6 = arith.constant 0 : index
    %c0_7 = arith.constant 0 : index
    %10 = vector.load %arg4[%c0_6, %c0_7] : memref<128x128xbf16, #tpu.memory_space<vmem>>, vector<128x128xbf16>
    %cst_8 = arith.constant dense<0.000000e+00> : vector<8x128xf32>
    %11 = tpu.matmul %9, %10, %cst_8 {dimension_numbers = #tpu.dot_dimension_numbers<[1], [0], [0], [1], [0, 0, 1, 1], [], []>} : vector<8x128xbf16>, vector<128x128xbf16>, vector<8x128xf32> -> vector<8x128xf32>
    %c0_9 = arith.constant 0 : index
    %c0_10 = arith.constant 0 : index
    %12 = vector.load %arg5[%c0_9, %c0_10] : memref<1x128xf32, #tpu.memory_space<vmem>>, vector<1x128xf32>
    %13 = vector.broadcast %12 : vector<1x128xf32> to vector<8x128xf32>
    %14 = arith.addf %11, %13 : vector<8x128xf32>
    %cst_11 = arith.constant 0.000000e+00 : f32
    %15 = vector.broadcast %cst_11 : f32 to vector<8x128xf32>
    %16 = arith.maximumf %14, %15 : vector<8x128xf32>
    %17 = arith.truncf %16 : vector<8x128xf32> to vector<8x128xbf16>
    %c0_12 = arith.constant 0 : index
    %c0_13 = arith.constant 0 : index
    %18 = vector.load %arg6[%c0_12, %c0_13] : memref<128x128xbf16, #tpu.memory_space<vmem>>, vector<128x128xbf16>
    %cst_14 = arith.constant dense<0.000000e+00> : vector<8x128xf32>
    %19 = tpu.matmul %17, %18, %cst_14 {dimension_numbers = #tpu.dot_dimension_numbers<[1], [0], [0], [1], [0, 0, 1, 1], [], []>} : vector<8x128xbf16>, vector<128x128xbf16>, vector<8x128xf32> -> vector<8x128xf32>
    %c0_15 = arith.constant 0 : index
    %c0_16 = arith.constant 0 : index
    %20 = vector.load %arg7[%c0_15, %c0_16] : memref<1x128xf32, #tpu.memory_space<vmem>>, vector<1x128xf32>
    %21 = vector.broadcast %20 : vector<1x128xf32> to vector<8x128xf32>
    %22 = arith.addf %19, %21 : vector<8x128xf32>
    %23 = vector.extract_strided_slice %22 {offsets = [0, 0], sizes = [8, 4], strides = [1, 1]} : vector<8x128xf32> to vector<8x4xf32>
    %c0_17 = arith.constant 0 : index
    %c0_18 = arith.constant 0 : index
    %24 = vector.load %arg8[%c0_17, %c0_18] : memref<8x4xf32, #tpu.memory_space<vmem>>, vector<8x4xf32>
    tpu.vector_store %arg8[%c0_17, %c0_18], %23 {strides = array<i32>} : memref<8x4xf32, #tpu.memory_space<vmem>>, vector<8x4xf32>,
    return
  }
  func.func @transform_0(%arg0: i32) -> (i32, i32) {
    %c0_i32 = arith.constant 0 : i32
    %c0_i32_0 = arith.constant 0 : i32
    return %arg0, %c0_i32 : i32, i32
  }
  func.func @transform_1(%arg0: i32) -> (i32, i32) {
    %c0_i32 = arith.constant 0 : i32
    %c0_i32_0 = arith.constant 0 : i32
    %c0_i32_1 = arith.constant 0 : i32
    return %c0_i32, %c0_i32_0 : i32, i32
  }
  func.func @transform_2(%arg0: i32) -> (i32, i32) {
    %c0_i32 = arith.constant 0 : i32
    %c0_i32_0 = arith.constant 0 : i32
    %c0_i32_1 = arith.constant 0 : i32
    return %c0_i32, %c0_i32_0 : i32, i32
  }
  func.func @transform_3(%arg0: i32) -> (i32, i32) {
    %c0_i32 = arith.constant 0 : i32
    %c0_i32_0 = arith.constant 0 : i32
    %c0_i32_1 = arith.constant 0 : i32
    return %c0_i32, %c0_i32_0 : i32, i32
  }
  func.func @transform_4(%arg0: i32) -> (i32, i32) {
    %c0_i32 = arith.constant 0 : i32
    %c0_i32_0 = arith.constant 0 : i32
    %c0_i32_1 = arith.constant 0 : i32
    return %c0_i32, %c0_i32_0 : i32, i32
  }
  func.func @transform_5(%arg0: i32) -> (i32, i32) {
    %c0_i32 = arith.constant 0 : i32
    %c0_i32_0 = arith.constant 0 : i32
    %c0_i32_1 = arith.constant 0 : i32
    return %c0_i32, %c0_i32_0 : i32, i32
  }
  func.func @transform_6(%arg0: i32) -> (i32, i32) {
    %c0_i32 = arith.constant 0 : i32
    %c0_i32_0 = arith.constant 0 : i32
    %c0_i32_1 = arith.constant 0 : i32
    return %c0_i32, %c0_i32_0 : i32, i32
  }
  func.func @transform_7(%arg0: i32) -> (i32, i32) {
    %c0_i32 = arith.constant 0 : i32
    %c0_i32_0 = arith.constant 0 : i32
    return %arg0, %c0_i32 : i32, i32
  }
}

</mosaic_0001>

<bundles_post_ra>
// kernel: tpu_custom_call.1
= control target key start
LH: loop header
LB: loop body
LE: loop exit
PB: predicated region body
PF: predicated region fallthrough
CT: control target
= control target key end

     0   :  { %12 = vsyncpa [#allocation3], 0  ;;  %s706_s0 = inlined_call_operand.hbm [shape: f32[8,8], index: 0, kind: input, shape index: {}]   ;;  %s707_s1 = inlined_call_operand.hbm [shape: bf16[8,128], index: 1, kind: input, shape index: {}]   ;;  %s708_s2 = inlined_call_operand.vmem [shape: f32[1,128], index: 2, kind: input, shape index: {}]   ;;  %s709_s3 = inlined_call_operand.hbm [shape: bf16[128,128], index: 3, kind: input, shape index: {}]   ;;  %s710_s4 = inlined_call_operand.vmem [shape: f32[1,128], index: 4, kind: input, shape index: {}]   ;;  %s711_s5 = inlined_call_operand.hbm [shape: bf16[128,128], index: 5, kind: input, shape index: {}]   ;;  %s712_s6 = inlined_call_operand.vmem [shape: f32[1,128], index: 6, kind: input, shape index: {}]   ;;  %s713_s7 = inlined_call_operand.vmem [shape: f32[8,4], index: 7, kind: output, shape index: {}]  }
   0x1   :  { %13 = vsyncpa [#allocation5], 0 }
   0x2   :  { %14 = vsyncpa [#allocation8], 0  ;;  %s575_s24 = smov [#allocation4]   ;;  %s576_s26 = smov [#allocation2]  }
   0x3   :  { %s31_s25 = sshll.u32 %s575_s24, 4  ;;  %s21_s27 = sshll.u32 %s576_s26, 4  ;;  %s32_s25 = int_to_ptr.vmem [resolvable:$true] %s31_s25  ;;  %s22_s27 = int_to_ptr.vmem [resolvable:$true] %s21_s27 }
   0x4   :  { %s481_s30 = scalar_lea.hbm %s707_s1, 64 }
   0x5   :  { %p482_p0 = scmp.ne.s32.totalorder %s707_s1, %s481_s30  ;;  %p485_p1 = scmp.lt.u32.totalorder %s481_s30, %s707_s1 }
   0x7   :  { %p487_p2 = pnand %p485_p1, %p482_p0 }
   0x9   :  { %490 = shalt.err (!%p487_p2)
}
   0xa   :  { %s491_s12 = scalar_lea.vmem %s32_s25, 64  ;;  %p496_p4 = scmp.lt.s32.totalorder %s32_s25, %s32_s25 }
   0xb   :  { %p492_p3 = scmp.ne.s32.totalorder %s32_s25, %s491_s12  ;;  %p497_p5 = scmp.lt.s32.totalorder %s491_s12, %s491_s12 }
   0xd   :  { %p498_p6 = por %p497_p5, %p496_p4 }
   0xf   :  { %p499_p7 = pnand %p498_p6, %p492_p3 }
  0x11   :  { %502 = shalt.err (!%p499_p7)
}
  0x12   :  { %34 = dma.hbm_to_vmem [thread:$0]  %s707_s1, 64, %s32_s25, [#allocation5]  }
  0x13   :  { %s503_s17 = scalar_lea.hbm %s706_s0, 128 }
  0x14   :  { %p504_p8 = scmp.ne.s32.totalorder %s706_s0, %s503_s17  ;;  %p507_p9 = scmp.lt.u32.totalorder %s503_s17, %s706_s0 }
  0x16   :  { %p509_p10 = pnand %p507_p9, %p504_p8 }
  0x18   :  { %512 = shalt.err (!%p509_p10)
}
  0x19   :  { %s513_s22 = scalar_lea.vmem %s22_s27, 128  ;;  %p518_p12 = scmp.lt.s32.totalorder %s22_s27, %s22_s27 }
  0x1a   :  { %p514_p11 = scmp.ne.s32.totalorder %s22_s27, %s513_s22  ;;  %p519_p13 = scmp.lt.s32.totalorder %s513_s22, %s513_s22 }
  0x1c   :  { %p520_p0 = por %p519_p13, %p518_p12 }
  0x1e   :  { %p521_p1 = pnand %p520_p0, %p514_p11 }
  0x20   :  { %524 = shalt.err (!%p521_p1)
}
  0x21   :  { %24 = dma.hbm_to_vmem [thread:$0]  %s706_s0, 128, %s22_s27, [#allocation3]  }
  0x22   :  { %s577_s24 = smov [#allocation6]   ;;  %s525_s29 = scalar_lea.hbm %s709_s3, 1024 }
  0x23   :  { %s42_s25 = sshll.u32 %s577_s24, 4  ;;  %p526_p2 = scmp.ne.s32.totalorder %s709_s3, %s525_s29  ;;  %s43_s25 = int_to_ptr.vmem [resolvable:$true] %s42_s25 }
  0x24   :  { %p529_p3 = scmp.lt.u32.totalorder %s525_s29, %s709_s3 }
  0x26   :  { %p531_p4 = pnand %p529_p3, %p526_p2 }
  0x28   :  { %534 = shalt.err (!%p531_p4)
}
  0x29   :  { %s535_s11 = scalar_lea.vmem %s43_s25, 1024  ;;  %p540_p6 = scmp.lt.s32.totalorder %s43_s25, %s43_s25 }
  0x2a   :  { %p536_p5 = scmp.ne.s32.totalorder %s43_s25, %s535_s11  ;;  %p541_p7 = scmp.lt.s32.totalorder %s535_s11, %s535_s11 }
  0x2c   :  { %p542_p8 = por %p541_p7, %p540_p6 }
  0x2e   :  { %p543_p9 = pnand %p542_p8, %p536_p5 }
  0x30   :  { %546 = shalt.err (!%p543_p9)
}
  0x31   :  { %s578_s0 = smov 64   ;;  %s579_s27 = smov 4  }
  0x32   :  { %48 = dma.hbm_to_vmem [thread:$0]  %s709_s3, 1024, %s43_s25, [#allocation5], %s578_s0, %s578_s0, %s579_s27  }
  0x33   :  { %s580_s14 = smov [#allocation7]   ;;  %s547_s18 = scalar_lea.hbm %s711_s5, 1024 }
  0x34   :  { %s56_s15 = sshll.u32 %s580_s14, 4  ;;  %p548_p10 = scmp.ne.s32.totalorder %s711_s5, %s547_s18  ;;  %s57_s15 = int_to_ptr.vmem [resolvable:$true] %s56_s15 }
  0x35   :  { %p551_p11 = scmp.lt.u32.totalorder %s547_s18, %s711_s5 }
  0x37   :  { %p553_p12 = pnand %p551_p11, %p548_p10 }
  0x39   :  { %556 = shalt.err (!%p553_p12)
}
  0x3a   :  { %s557_s1 = scalar_lea.vmem %s57_s15, 1024  ;;  %p562_p0 = scmp.lt.s32.totalorder %s57_s15, %s57_s15 }
  0x3b   :  { %p558_p13 = scmp.ne.s32.totalorder %s57_s15, %s557_s1  ;;  %p563_p1 = scmp.lt.s32.totalorder %s557_s1, %s557_s1 }
  0x3d   :  { %p564_p2 = por %p563_p1, %p562_p0 }
  0x3f   :  { %p565_p3 = pnand %p564_p2, %p558_p13 }
  0x41   :  { %568 = shalt.err (!%p565_p3)
}
  0x42   :  { %62 = dma.hbm_to_vmem [thread:$0]  %s711_s5, 1024, %s57_s15, [#allocation8], %s578_s0, %s578_s0, %s579_s27  }
  0x43   :  { %569 = dma.done.wait [#allocation3], 128  }
  0x44   :  { %570 = vsyncadd [#allocation3], 4294967168 }
  0x45   :  { %571 = dma.done.wait [#allocation5], 1088  }
  0x46   :  { %572 = vsyncadd [#allocation5], 4294966208 }
  0x47   :  { %573 = dma.done.wait [#allocation8], 1024  }
  0x48   :  { %574 = vsyncadd [#allocation8], 4294966272  ;;  %v581_v0 = vmov 0.0   ;;  %vm582_vm0 = vmmov 0   ;;  %vm92_vm1 = vcmask 1043456   ;;  %v78_v2 = vld [vmem:[#allocation2] sm:$0xff] }
  0x49   :  { %411 = vmatprep.subr.bf16.mxu0 %v581_v0  ;;  %413 = vmatprep.mubr.msk.bf16.mxu0 %vm582_vm0, %v581_v0  ;;  %v80_v1 = vld [vmem:[#allocation4] sm:$0xf]  ;;  %v79_v4 = vpack.c.bf16 %v78_v2, %v78_v2  ;;  %v465_v5 = vld [vmem:[#allocation6] sm:$0xff]   ;;  %vm88_vm2 = vcmask 64512   ;;  %v466_v6 = vld [vmem:[#allocation6 + $0x8] sm:$0xff]   ;;  %vm362_vm3 = vcmask 31744  }
  0x4a   :  { %417 = vmatprep.subr.bf16.mxu1 %v581_v0  ;;  %433 = vmatprep.mubr.msk.bf16.mxu1 %vm582_vm0, %v581_v0  ;;  %v94_v3 = vsel %vm92_vm1, %v80_v1, 0  ;;  %v467_v7 = vld [vmem:[#allocation6 + $0x10] sm:$0xff]   ;;  %v468_v8 = vld [vmem:[#allocation6 + $0x18] sm:$0xff]   ;;  %v469_v9 = vld [vmem:[#allocation6 + $0x20] sm:$0xff]  }
  0x4b   :  { %412 = vmatpush3.bf16.msra.mxu0 %v94_v3  ;;  %418 = vmatpush3.bf16.msra.mxu1 %v465_v5  ;;  %v470_v10 = vld [vmem:[#allocation6 + $0x28] sm:$0xff]   ;;  %v471_v11 = vld [vmem:[#allocation6 + $0x30] sm:$0xff]   ;;  %v472_v12 = vld [vmem:[#allocation6 + $0x38] sm:$0xff]  }
  0x4c   :  { %437 = vmatprep.subr.bf16.mxu0 %v581_v0  ;;  %419 = vmatprep.subr.bf16.mxu1 %v581_v0  ;;  %v473_v13 = vld [vmem:[#allocation7] sm:$0xff]   ;;  %v474_v14 = vld [vmem:[#allocation7 + $0x8] sm:$0xff]   ;;  %v475_v15 = vld [vmem:[#allocation7 + $0x10] sm:$0xff]  }
  0x4d   :  { %v476_v16 = vld [vmem:[#allocation7 + $0x18] sm:$0xff]   ;;  %v477_v17 = vld [vmem:[#allocation7 + $0x20] sm:$0xff]   ;;  %v478_v18 = vld [vmem:[#allocation7 + $0x28] sm:$0xff]  }
  0x4e   :  { %414 = vmatmul.mubr.msk.bf16.vlgmr.msra.gmra.mrb[0].mxu0 %vm88_vm2, %v79_v4  ;;  %v371_v19 = vld [vmem:[%s708_s2] ss:$0 sm:$0xff]  ;;  %v480_v28 = vld [vmem:[#allocation7 + $0x38] sm:$0xff]  }
  0x4f   :  { %453 = vmatprep.mubr.msk.bf16.mxu0 %vm582_vm0, %v581_v0  ;;  %420 = vmatpush3.bf16.msra.mxu1 %v466_v6  ;;  %v479_v27 = vld [vmem:[#allocation7 + $0x30] sm:$0xff]  }
  0x50   :  { %421 = vmatprep.subr.bf16.mxu1 %v581_v0  ;;  %438 = vmatpush3.bf16.msra.mxu0 %v473_v13  ;;  %v373_v29 = vld [vmem:[%s710_s4] ss:$0 sm:$0xff] }
  0x51   :  { %439 = vmatprep.subr.bf16.mxu0 %v581_v0  ;;  %v382_v37 = vld [vmem:[%s712_s6] ss:$0 sm:$0xff] }
  0x53   :  { %422 = vmatpush3.bf16.msra.mxu1 %v467_v7 }
  0x54   :  { %423 = vmatprep.subr.bf16.mxu1 %v581_v0  ;;  %440 = vmatpush3.bf16.msra.mxu0 %v474_v14 }
  0x55   :  { %441 = vmatprep.subr.bf16.mxu0 %v581_v0 }
  0x57   :  { %424 = vmatpush3.bf16.msra.mxu1 %v468_v8 }
  0x58   :  { %425 = vmatprep.subr.bf16.mxu1 %v581_v0  ;;  %442 = vmatpush3.bf16.msra.mxu0 %v475_v15 }
  0x59   :  { %443 = vmatprep.subr.bf16.mxu0 %v581_v0 }
  0x5b   :  { %426 = vmatpush3.bf16.msra.mxu1 %v469_v9 }
  0x5c   :  { %427 = vmatprep.subr.bf16.mxu1 %v581_v0  ;;  %444 = vmatpush3.bf16.msra.mxu0 %v476_v16 }
  0x5d   :  { %445 = vmatprep.subr.bf16.mxu0 %v581_v0 }
  0x5f   :  { %428 = vmatpush3.bf16.msra.mxu1 %v470_v10 }
  0x60   :  { %429 = vmatprep.subr.bf16.mxu1 %v581_v0  ;;  %446 = vmatpush3.bf16.msra.mxu0 %v477_v17 }
  0x61   :  { %447 = vmatprep.subr.bf16.mxu0 %v581_v0 }
  0x63   :  { %430 = vmatpush3.bf16.msra.mxu1 %v471_v11 }
  0x64   :  { %431 = vmatprep.subr.bf16.mxu1 %v581_v0  ;;  %448 = vmatpush3.bf16.msra.mxu0 %v478_v18 }
  0x65   :  { %449 = vmatprep.subr.bf16.mxu0 %v581_v0 }
  0x67   :  { %432 = vmatpush3.bf16.msra.mxu1 %v472_v12 }
  0x68   :  { %450 = vmatpush3.bf16.msra.mxu0 %v479_v27 }
  0x69   :  { %451 = vmatprep.subr.bf16.mxu0 %v581_v0 }
  0x6c   :  { %452 = vmatpush3.bf16.msra.mxu0 %v480_v28 }
 0x121   :  { %v130_v20 = vpop.f32.mrb[0].mxu0 }
 0x122   :  { %v131_v21 = vadd.f32 %v371_v19, %v130_v20  ;;  %v415_v22 = vpop.f32.mrb[1].mxu0 }
 0x123   :  { %v133_v23 = vpop.f32.mrb[2].mxu0 }
 0x124   :  { %v136_v24 = vmax.f32 %v131_v21, 0.0  ;;  %v416_v25 = vpop.f32.mrb[3].mxu0 }
 0x126   :  { %v137_v26 = vpack.c.bf16 %v136_v24, %v136_v24 }
 0x128   :  { %434 = vmatmul.mubr.bf16.vlgmr.msra.gmra.mrb[0].mxu1 %v137_v26 }
 0x1fb   :  { %v243_v30 = vpop.f32.mrb[0].mxu1 }
 0x1fc   :  { %v244_v31 = vadd.f32 %v373_v29, %v243_v30  ;;  %v435_v32 = vpop.f32.mrb[1].mxu1 }
 0x1fd   :  { %v246_v33 = vpop.f32.mrb[2].mxu1 }
 0x1fe   :  { %v249_v34 = vmax.f32 %v244_v31, 0.0  ;;  %v436_v35 = vpop.f32.mrb[3].mxu1 }
 0x200   :  { %v250_v36 = vpack.c.bf16 %v249_v34, %v249_v34 }
 0x202   :  { %454 = vmatmul.mubr.bf16.vlgmr.msra.gmra.mrb[4].mxu0 %v250_v36 }
 0x2d5   :  { %v356_v38 = vpop.f32.mrb[4].mxu0 }
 0x2d6   :  { %v357_v39 = vadd.f32 %v382_v37, %v356_v38  ;;  %v455_v40 = vpop.f32.mrb[5].mxu0 }
 0x2d7   :  { %v359_v41 = vpop.f32.mrb[6].mxu0 }
 0x2d8   :  { %363 = vst.msk [vmem:[%s713_s7] sm:$0xff] %vm362_vm3, %v357_v39  ;;  %v456_v42 = vpop.f32.mrb[7].mxu0 }
 0x2d9   :  { %368 = vsyncpa [#allocation3], 1 }
 0x2da   :  { %369 = vsyncpa [#allocation5], 1 }
 0x2db   :  { %370 = vsyncpa [#allocation8], 1 }

</bundles_post_ra>
